<compile_context>
chip_gen: v6e
topology: v6e:2x2x1
jax: 0.10.0
libtpu: 0.0.40
codegen_flags: <defaults>
</compile_context>

<pallas_src>
import math

import jax
import jax.numpy as jnp
from jax.experimental import pallas as pl
from jax.experimental.pallas import tpu as pltpu


def _round_up(a: int, b: int) -> int:
    return ((a + b - 1) // b) * b


def _cdiv(a: int, b: int) -> int:
    return (a + b - 1) // b


def _make_seg_loss_kernel(loss_weight: float, n_per_batch: int, c_full: int,
                          tc: int, cw: int):
    lw = float(loss_weight)
    n_f = float(n_per_batch)
    n_chunks = tc // cw

    def kernel(x_ref, y_ref, out_ref, s_all_ref, s_one_ref, c_one_ref):
        # x_ref, y_ref : (R, tc) tiles of one batch row, native dtypes
        # out_ref      : (8, 128) lane-dense per-batch output slab
        # s_all/s_one/c_one : (R, cw) f32 accumulators, persist across lane axis
        k = pl.program_id(1)

        @pl.when(k == 0)
        def _init():
            s_all_ref[...] = jnp.zeros_like(s_all_ref)
            s_one_ref[...] = jnp.zeros_like(s_one_ref)
            c_one_ref[...] = jnp.zeros_like(c_one_ref)

        r = s_all_ref.shape[0]
        lane = jax.lax.broadcasted_iota(jnp.int32, (r, cw), 1)
        col0 = k * tc  # first global column covered by this tile

        # One read-modify-write of each small accumulator per grid step.
        s_all = s_all_ref[...]
        s_one = s_one_ref[...]
        c_one = c_one_ref[...]
        for j in range(n_chunks):           # static, lane-aligned chunk slices
            lo = j * cw
            xc = x_ref[:, lo:lo + cw].astype(jnp.float32)
            yc = y_ref[:, lo:lo + cw].astype(jnp.float32)
            valid = (lane + (col0 + lo)) < c_full     # ragged-lane mask
            is_one = yc == 1.0
            # Single clamped log per element (exact for binary masks):
            #   y==1 -> log(x), y==0 -> log(1-x); BCELoss clamps log terms at -100.
            p = jnp.where(is_one, xc, 1.0 - xc)
            p = jnp.maximum(p, 0.0)          # x marginally outside [0,1] -> -100, not NaN
            lg = jnp.maximum(jnp.log(p), -100.0)
            lg = jnp.where(valid, lg, 0.0)   # ragged lanes contribute nothing
            s_all = s_all + lg
            s_one = s_one + jnp.where(is_one, lg, 0.0)
            c_one = c_one + jnp.where(valid, yc, 0.0)
        s_all_ref[...] = s_all
        s_one_ref[...] = s_one
        c_one_ref[...] = c_one

        @pl.when(k == pl.num_programs(1) - 1)
        def _finalize():
            sa = jnp.sum(s_all_ref[...], keepdims=True)   # (1, 1)
            s1 = jnp.sum(s_one_ref[...], keepdims=True)
            c1 = jnp.sum(c_one_ref[...], keepdims=True)
            c0 = n_f - c1            # y binary; ragged lanes already excluded
            s0 = sa - s1
            t1 = jnp.where(c1 > 0.0, s1 / jnp.maximum(c1, 1.0), 0.0)
            t0 = jnp.where(c0 > 0.0, s0 / jnp.maximum(c0, 1.0), 0.0)
            loss = -(t1 + t0) * lw
            out_ref[...] = jnp.broadcast_to(loss, out_ref.shape)

    return kernel


def seg_loss(x, y, loss_weight: float = 1.0, *, max_tile_elems: int = 262144):
    """x: [B, ...] probabilities in [0, 1]; y: same-shape binary {0,1} mask.
    Returns the scalar sum-reduced BCE with per-batch class-balance weights."""
    B = x.shape[0]
    N = math.prod(x.shape[1:])

    # Sublane factor: largest of 32/16/8/... dividing N so each batch row fills vregs.
    # TODO(synk): if N has no small even factor, the R<8 fallback under-fills sublanes
    #             (correct, just slower).
    R = 1
    for cand in (32, 16, 8, 4, 2):
        if N % cand == 0:
            R = cand
            break
    C = N // R

    # Row-major metadata reshape only; no padding, no dtype change in HBM.
    x3 = jnp.reshape(x, (B, R, C))
    y3 = jnp.reshape(y, (B, R, C))

    # Chunk width: keep per-chunk register partials at ~4 vregs per quantity.
    r_pad = max(R, 8)
    cw = max(128, ((4096 // r_pad) // 128) * 128)
    # Balanced lane tiling: big tiles (<= ~max_tile_elems elems per step) to amortize
    # per-step overhead, with at most one cw of masked lanes on the last tile.
    tc_cap = max(cw, ((max_tile_elems // r_pad) // cw) * cw)
    nk = _cdiv(C, tc_cap)
    tc = _round_up(_cdiv(C, nk), cw)
    nk = _cdiv(C, tc)

    cost = pl.CostEstimate(
        flops=14 * B * R * tc * nk,
        transcendentals=B * R * tc * nk,
        bytes_accessed=B * N * (x3.dtype.itemsize + y3.dtype.itemsize) + B * 8 * 128 * 4,
    )

    out = pl.pallas_call(
        _make_seg_loss_kernel(loss_weight, N, C, tc, cw),
        out_shape=jax.ShapeDtypeStruct((B, 8, 128), jnp.float32),
        grid_spec=pltpu.PrefetchScalarGridSpec(
            num_scalar_prefetch=0,
            grid=(B, nk),
            in_specs=[
                pl.BlockSpec((None, R, tc), lambda b, k: (b, 0, k)),
                pl.BlockSpec((None, R, tc), lambda b, k: (b, 0, k)),
            ],
            out_specs=pl.BlockSpec((None, 8, 128), lambda b, k: (b, 0, 0)),
            scratch_shapes=[
                pltpu.VMEM((R, cw), jnp.float32),  # sum of clamped logs, all valid lanes
                pltpu.VMEM((R, cw), jnp.float32),  # sum of clamped logs where y == 1
                pltpu.VMEM((R, cw), jnp.float32),  # count of y == 1
            ],
        ),
        compiler_params=pltpu.CompilerParams(
            dimension_semantics=("parallel", "arbitrary"),
        ),
        cost_estimate=cost,
    )(x3, y3)

    # Per-batch scalar loss is broadcast over the (8, 128) slab; sum batch rows.
    return jnp.sum(out[:, 0, 0])


def _reference_seg_loss(x, y, loss_weight=1.0):
    """Pure-JAX reference mirroring the PyTorch module (get_weighted + BCELoss(sum))."""
    B = x.shape[0]
    xf = jnp.reshape(x, (B, -1)).astype(jnp.float32)
    yf = jnp.reshape(y, (B, -1)).astype(jnp.float32)
    is1 = yf == 1.0
    is0 = yf == 0.0
    nf = 1.0 / jnp.sum(is1, axis=1, keepdims=True)
    nb = 1.0 / jnp.sum(is0, axis=1, keepdims=True)
    w = jnp.where(is1, nf, jnp.where(is0, nb, 1.0)) * loss_weight
    log_x = jnp.maximum(jnp.log(xf), -100.0)
    log_1mx = jnp.maximum(jnp.log(1.0 - xf), -100.0)
    return jnp.sum(w * (-(yf * log_x + (1.0 - yf) * log_1mx)))


if __name__ == "__main__":
    key = jax.random.PRNGKey(0)
    kx, ky = jax.random.split(key)

    # N = 1*100*100 = 10000: not a multiple of 128, so the last lane tile is ragged
    # and masked in-kernel; R = 16 sublane packing; parallel grid axis length = B = 2.
    B, C, H, W = 2, 1, 100, 100
    x = jax.random.uniform(kx, (B, C, H, W), jnp.float32,
                           minval=1e-3, maxval=1.0 - 1e-3)
    # y stays bf16 in HBM (binary mask is exact in bf16); kernel upcasts per chunk.
    y = (jax.random.uniform(ky, (B, C, H, W)) > 0.5).astype(jnp.bfloat16)

    loss = jax.block_until_ready(seg_loss(x, y, 1.0))
    ref = jax.block_until_ready(_reference_seg_loss(x, y, 1.0))
    assert jnp.allclose(loss, ref, rtol=2e-5, atol=1e-4), (loss, ref)

    # Small tile cap forces nk > 1: exercises cross-step accumulation and the
    # ragged last tile together, plus a non-default loss_weight.
    loss2 = jax.block_until_ready(seg_loss(x, y, 0.5, max_tile_elems=4096))
    ref2 = jax.block_until_ready(_reference_seg_loss(x, y, 0.5))
    assert jnp.allclose(loss2, ref2, rtol=2e-5, atol=1e-4), (loss2, ref2)

    print("KERNEL_OK")
</pallas_src>

<mosaic_0001>
module attributes {stable_mosaic.version = 11 : i64} {
  func.func @kernel(%arg0: i32, %arg1: i32, %arg2: memref<1x16x768xf32, #tpu.memory_space<vmem>>, %arg3: memref<1x16x768xbf16, #tpu.memory_space<vmem>>, %arg4: memref<1x8x128xf32, #tpu.memory_space<vmem>>, %arg5: memref<16x256xf32, #tpu.memory_space<vmem>>, %arg6: memref<16x256xf32, #tpu.memory_space<vmem>>, %arg7: memref<16x256xf32, #tpu.memory_space<vmem>>) attributes {dimension_semantics = [#tpu.dimension_semantics<parallel>, #tpu.dimension_semantics<arbitrary>], iteration_bounds = array<i64: 2, 1>, scalar_prefetch = 0 : i64, scratch_operands = 3 : i64, tpu.core_type = #tpu.core_type<tc>, window_params = [{transform_indices = @transform_0, window_bounds = array<i64: 1, 16, 768>}, {transform_indices = @transform_1, window_bounds = array<i64: 1, 16, 768>}, {transform_indices = @transform_2, window_bounds = array<i64: 1, 8, 128>}]} {
    %c0_i32 = arith.constant 0 : i32
    %0 = arith.cmpi eq, %arg1, %c0_i32 : i32
    %1 = arith.extui %0 : i1 to i32
    %c0_i32_0 = arith.constant 0 : i32
    %2 = arith.cmpi ne, %1, %c0_i32_0 : i32
    scf.if %2 {
      %cst_53 = arith.constant 0.000000e+00 : f32
      %101 = vector.broadcast %cst_53 : f32 to vector<16x256xf32>
      %c0_54 = arith.constant 0 : index
      %c0_55 = arith.constant 0 : index
      %102 = vector.load %arg5[%c0_54, %c0_55] : memref<16x256xf32, #tpu.memory_space<vmem>>, vector<16x256xf32>
      tpu.vector_store %arg5[%c0_54, %c0_55], %101 {strides = array<i32>} : memref<16x256xf32, #tpu.memory_space<vmem>>, vector<16x256xf32>,
      %cst_56 = arith.constant 0.000000e+00 : f32
      %103 = vector.broadcast %cst_56 : f32 to vector<16x256xf32>
      %c0_57 = arith.constant 0 : index
      %c0_58 = arith.constant 0 : index
      %104 = vector.load %arg6[%c0_57, %c0_58] : memref<16x256xf32, #tpu.memory_space<vmem>>, vector<16x256xf32>
      tpu.vector_store %arg6[%c0_57, %c0_58], %103 {strides = array<i32>} : memref<16x256xf32, #tpu.memory_space<vmem>>, vector<16x256xf32>,
      %cst_59 = arith.constant 0.000000e+00 : f32
      %105 = vector.broadcast %cst_59 : f32 to vector<16x256xf32>
      %c0_60 = arith.constant 0 : index
      %c0_61 = arith.constant 0 : index
      %106 = vector.load %arg7[%c0_60, %c0_61] : memref<16x256xf32, #tpu.memory_space<vmem>>, vector<16x256xf32>
      tpu.vector_store %arg7[%c0_60, %c0_61], %105 {strides = array<i32>} : memref<16x256xf32, #tpu.memory_space<vmem>>, vector<16x256xf32>,
    } else {
    }
    %3 = tpu.iota {dimensions = array<i32: 1>} : vector<16x256xi32>
    %c768_i32 = arith.constant 768 : i32
    %4 = arith.muli %arg1, %c768_i32 : i32
    %c0 = arith.constant 0 : index
    %c0_1 = arith.constant 0 : index
    %5 = vector.load %arg5[%c0, %c0_1] : memref<16x256xf32, #tpu.memory_space<vmem>>, vector<16x256xf32>
    %c0_2 = arith.constant 0 : index
    %c0_3 = arith.constant 0 : index
    %6 = vector.load %arg6[%c0_2, %c0_3] : memref<16x256xf32, #tpu.memory_space<vmem>>, vector<16x256xf32>
    %c0_4 = arith.constant 0 : index
    %c0_5 = arith.constant 0 : index
    %7 = vector.load %arg7[%c0_4, %c0_5] : memref<16x256xf32, #tpu.memory_space<vmem>>, vector<16x256xf32>
    %c0_6 = arith.constant 0 : index
    %c0_7 = arith.constant 0 : index
    %c0_8 = arith.constant 0 : index
    %8 = vector.load %arg2[%c0_6, %c0_7, %c0_8] : memref<1x16x768xf32, #tpu.memory_space<vmem>>, vector<1x16x256xf32>
    %9 = vector.shape_cast %8 : vector<1x16x256xf32> to vector<16x256xf32>
    %c0_9 = arith.constant 0 : index
    %c0_10 = arith.constant 0 : index
    %c0_11 = arith.constant 0 : index
    %10 = vector.load %arg3[%c0_9, %c0_10, %c0_11] : memref<1x16x768xbf16, #tpu.memory_space<vmem>>, vector<1x16x256xbf16>
    %11 = vector.shape_cast %10 : vector<1x16x256xbf16> to vector<16x256xbf16>
    %12 = arith.extf %11 : vector<16x256xbf16> to vector<16x256xf32>
    %c0_i32_12 = arith.constant 0 : i32
    %13 = arith.addi %4, %c0_i32_12 : i32
    %14 = vector.broadcast %13 : i32 to vector<16x256xi32>
    %15 = arith.addi %3, %14 : vector<16x256xi32>
    %c625_i32 = arith.constant 625 : i32
    %16 = vector.broadcast %c625_i32 : i32 to vector<16x256xi32>
    %17 = arith.cmpi slt, %15, %16 : vector<16x256xi32>
    %cst = arith.constant 1.000000e+00 : f32
    %18 = vector.broadcast %cst : f32 to vector<16x256xf32>
    %19 = arith.cmpf oeq, %12, %18 : vector<16x256xf32>
    %cst_13 = arith.constant 1.000000e+00 : f32
    %20 = vector.broadcast %cst_13 : f32 to vector<16x256xf32>
    %21 = arith.subf %20, %9 : vector<16x256xf32>
    %22 = arith.select %19, %9, %21 : vector<16x256xi1>, vector<16x256xf32>
    %cst_14 = arith.constant 0.000000e+00 : f32
    %23 = vector.broadcast %cst_14 : f32 to vector<16x256xf32>
    %24 = arith.maximumf %22, %23 : vector<16x256xf32>
    %25 = math.log %24 : vector<16x256xf32>
    %cst_15 = arith.constant -1.000000e+02 : f32
    %26 = vector.broadcast %cst_15 : f32 to vector<16x256xf32>
    %27 = arith.maximumf %25, %26 : vector<16x256xf32>
    %cst_16 = arith.constant 0.000000e+00 : f32
    %28 = vector.broadcast %cst_16 : f32 to vector<16x256xf32>
    %29 = arith.select %17, %27, %28 : vector<16x256xi1>, vector<16x256xf32>
    %30 = arith.addf %5, %29 : vector<16x256xf32>
    %cst_17 = arith.constant 0.000000e+00 : f32
    %31 = vector.broadcast %cst_17 : f32 to vector<16x256xf32>
    %32 = arith.select %19, %29, %31 : vector<16x256xi1>, vector<16x256xf32>
    %33 = arith.addf %6, %32 : vector<16x256xf32>
    %cst_18 = arith.constant 0.000000e+00 : f32
    %34 = vector.broadcast %cst_18 : f32 to vector<16x256xf32>
    %35 = arith.select %17, %12, %34 : vector<16x256xi1>, vector<16x256xf32>
    %36 = arith.addf %7, %35 : vector<16x256xf32>
    %c0_19 = arith.constant 0 : index
    %c0_20 = arith.constant 0 : index
    %c256 = arith.constant 256 : index
    %37 = vector.load %arg2[%c0_19, %c0_20, %c256] : memref<1x16x768xf32, #tpu.memory_space<vmem>>, vector<1x16x256xf32>
    %38 = vector.shape_cast %37 : vector<1x16x256xf32> to vector<16x256xf32>
    %c0_21 = arith.constant 0 : index
    %c0_22 = arith.constant 0 : index
    %c256_23 = arith.constant 256 : index
    %39 = vector.load %arg3[%c0_21, %c0_22, %c256_23] : memref<1x16x768xbf16, #tpu.memory_space<vmem>>, vector<1x16x256xbf16>
    %40 = vector.shape_cast %39 : vector<1x16x256xbf16> to vector<16x256xbf16>
    %41 = arith.extf %40 : vector<16x256xbf16> to vector<16x256xf32>
    %c256_i32 = arith.constant 256 : i32
    %42 = arith.addi %4, %c256_i32 : i32
    %43 = vector.broadcast %42 : i32 to vector<16x256xi32>
    %44 = arith.addi %3, %43 : vector<16x256xi32>
    %c625_i32_24 = arith.constant 625 : i32
    %45 = vector.broadcast %c625_i32_24 : i32 to vector<16x256xi32>
    %46 = arith.cmpi slt, %44, %45 : vector<16x256xi32>
    %cst_25 = arith.constant 1.000000e+00 : f32
    %47 = vector.broadcast %cst_25 : f32 to vector<16x256xf32>
    %48 = arith.cmpf oeq, %41, %47 : vector<16x256xf32>
    %cst_26 = arith.constant 1.000000e+00 : f32
    %49 = vector.broadcast %cst_26 : f32 to vector<16x256xf32>
    %50 = arith.subf %49, %38 : vector<16x256xf32>
    %51 = arith.select %48, %38, %50 : vector<16x256xi1>, vector<16x256xf32>
    %cst_27 = arith.constant 0.000000e+00 : f32
    %52 = vector.broadcast %cst_27 : f32 to vector<16x256xf32>
    %53 = arith.maximumf %51, %52 : vector<16x256xf32>
    %54 = math.log %53 : vector<16x256xf32>
    %cst_28 = arith.constant -1.000000e+02 : f32
    %55 = vector.broadcast %cst_28 : f32 to vector<16x256xf32>
    %56 = arith.maximumf %54, %55 : vector<16x256xf32>
    %cst_29 = arith.constant 0.000000e+00 : f32
    %57 = vector.broadcast %cst_29 : f32 to vector<16x256xf32>
    %58 = arith.select %46, %56, %57 : vector<16x256xi1>, vector<16x256xf32>
    %59 = arith.addf %30, %58 : vector<16x256xf32>
    %cst_30 = arith.constant 0.000000e+00 : f32
    %60 = vector.broadcast %cst_30 : f32 to vector<16x256xf32>
    %61 = arith.select %48, %58, %60 : vector<16x256xi1>, vector<16x256xf32>
    %62 = arith.addf %33, %61 : vector<16x256xf32>
    %cst_31 = arith.constant 0.000000e+00 : f32
    %63 = vector.broadcast %cst_31 : f32 to vector<16x256xf32>
    %64 = arith.select %46, %41, %63 : vector<16x256xi1>, vector<16x256xf32>
    %65 = arith.addf %36, %64 : vector<16x256xf32>
    %c0_32 = arith.constant 0 : index
    %c0_33 = arith.constant 0 : index
    %c512 = arith.constant 512 : index
    %66 = vector.load %arg2[%c0_32, %c0_33, %c512] : memref<1x16x768xf32, #tpu.memory_space<vmem>>, vector<1x16x256xf32>
    %67 = vector.shape_cast %66 : vector<1x16x256xf32> to vector<16x256xf32>
    %c0_34 = arith.constant 0 : index
    %c0_35 = arith.constant 0 : index
    %c512_36 = arith.constant 512 : index
    %68 = vector.load %arg3[%c0_34, %c0_35, %c512_36] : memref<1x16x768xbf16, #tpu.memory_space<vmem>>, vector<1x16x256xbf16>
    %69 = vector.shape_cast %68 : vector<1x16x256xbf16> to vector<16x256xbf16>
    %70 = arith.extf %69 : vector<16x256xbf16> to vector<16x256xf32>
    %c512_i32 = arith.constant 512 : i32
    %71 = arith.addi %4, %c512_i32 : i32
    %72 = vector.broadcast %71 : i32 to vector<16x256xi32>
    %73 = arith.addi %3, %72 : vector<16x256xi32>
    %c625_i32_37 = arith.constant 625 : i32
    %74 = vector.broadcast %c625_i32_37 : i32 to vector<16x256xi32>
    %75 = arith.cmpi slt, %73, %74 : vector<16x256xi32>
    %cst_38 = arith.constant 1.000000e+00 : f32
    %76 = vector.broadcast %cst_38 : f32 to vector<16x256xf32>
    %77 = arith.cmpf oeq, %70, %76 : vector<16x256xf32>
    %cst_39 = arith.constant 1.000000e+00 : f32
    %78 = vector.broadcast %cst_39 : f32 to vector<16x256xf32>
    %79 = arith.subf %78, %67 : vector<16x256xf32>
    %80 = arith.select %77, %67, %79 : vector<16x256xi1>, vector<16x256xf32>
    %cst_40 = arith.constant 0.000000e+00 : f32
    %81 = vector.broadcast %cst_40 : f32 to vector<16x256xf32>
    %82 = arith.maximumf %80, %81 : vector<16x256xf32>
    %83 = math.log %82 : vector<16x256xf32>
    %cst_41 = arith.constant -1.000000e+02 : f32
    %84 = vector.broadcast %cst_41 : f32 to vector<16x256xf32>
    %85 = arith.maximumf %83, %84 : vector<16x256xf32>
    %cst_42 = arith.constant 0.000000e+00 : f32
    %86 = vector.broadcast %cst_42 : f32 to vector<16x256xf32>
    %87 = arith.select %75, %85, %86 : vector<16x256xi1>, vector<16x256xf32>
    %88 = arith.addf %59, %87 : vector<16x256xf32>
    %cst_43 = arith.constant 0.000000e+00 : f32
    %89 = vector.broadcast %cst_43 : f32 to vector<16x256xf32>
    %90 = arith.select %77, %87, %89 : vector<16x256xi1>, vector<16x256xf32>
    %91 = arith.addf %62, %90 : vector<16x256xf32>
    %cst_44 = arith.constant 0.000000e+00 : f32
    %92 = vector.broadcast %cst_44 : f32 to vector<16x256xf32>
    %93 = arith.select %75, %70, %92 : vector<16x256xi1>, vector<16x256xf32>
    %94 = arith.addf %65, %93 : vector<16x256xf32>
    %c0_45 = arith.constant 0 : index
    %c0_46 = arith.constant 0 : index
    %95 = vector.load %arg5[%c0_45, %c0_46] : memref<16x256xf32, #tpu.memory_space<vmem>>, vector<16x256xf32>
    tpu.vector_store %arg5[%c0_45, %c0_46], %88 {strides = array<i32>} : memref<16x256xf32, #tpu.memory_space<vmem>>, vector<16x256xf32>,
    %c0_47 = arith.constant 0 : index
    %c0_48 = arith.constant 0 : index
    %96 = vector.load %arg6[%c0_47, %c0_48] : memref<16x256xf32, #tpu.memory_space<vmem>>, vector<16x256xf32>
    tpu.vector_store %arg6[%c0_47, %c0_48], %91 {strides = array<i32>} : memref<16x256xf32, #tpu.memory_space<vmem>>, vector<16x256xf32>,
    %c0_49 = arith.constant 0 : index
    %c0_50 = arith.constant 0 : index
    %97 = vector.load %arg7[%c0_49, %c0_50] : memref<16x256xf32, #tpu.memory_space<vmem>>, vector<16x256xf32>
    tpu.vector_store %arg7[%c0_49, %c0_50], %94 {strides = array<i32>} : memref<16x256xf32, #tpu.memory_space<vmem>>, vector<16x256xf32>,
    %c0_i32_51 = arith.constant 0 : i32
    %98 = arith.cmpi eq, %arg1, %c0_i32_51 : i32
    %99 = arith.extui %98 : i1 to i32
    %c0_i32_52 = arith.constant 0 : i32
    %100 = arith.cmpi ne, %99, %c0_i32_52 : i32
    scf.if %100 {
      %c0_53 = arith.constant 0 : index
      %c0_54 = arith.constant 0 : index
      %101 = vector.load %arg5[%c0_53, %c0_54] : memref<16x256xf32, #tpu.memory_space<vmem>>, vector<16x256xf32>
      %102 = vector.shape_cast %101 : vector<16x256xf32> to vector<1x16x256xf32>
      %cst_55 = arith.constant dense<0.000000e+00> : vector<1xf32>
      %103 = vector.multi_reduction <add>, %102, %cst_55 [1, 2] : vector<1x16x256xf32> to vector<1xf32>
      %104 = vector.shape_cast %103 : vector<1xf32> to vector<1x1x1xf32>
      %105 = vector.extract %104[0, 0, 0] : f32 from vector<1x1x1xf32>
      %106 = vector.broadcast %105 : f32 to vector<1x1xf32>
      %c0_56 = arith.constant 0 : index
      %c0_57 = arith.constant 0 : index
      %107 = vector.load %arg6[%c0_56, %c0_57] : memref<16x256xf32, #tpu.memory_space<vmem>>, vector<16x256xf32>
      %108 = vector.shape_cast %107 : vector<16x256xf32> to vector<1x16x256xf32>
      %cst_58 = arith.constant dense<0.000000e+00> : vector<1xf32>
      %109 = vector.multi_reduction <add>, %108, %cst_58 [1, 2] : vector<1x16x256xf32> to vector<1xf32>
      %110 = vector.shape_cast %109 : vector<1xf32> to vector<1x1x1xf32>
      %111 = vector.extract %110[0, 0, 0] : f32 from vector<1x1x1xf32>
      %112 = vector.broadcast %111 : f32 to vector<1x1xf32>
      %c0_59 = arith.constant 0 : index
      %c0_60 = arith.constant 0 : index
      %113 = vector.load %arg7[%c0_59, %c0_60] : memref<16x256xf32, #tpu.memory_space<vmem>>, vector<16x256xf32>
      %114 = vector.shape_cast %113 : vector<16x256xf32> to vector<1x16x256xf32>
      %cst_61 = arith.constant dense<0.000000e+00> : vector<1xf32>
      %115 = vector.multi_reduction <add>, %114, %cst_61 [1, 2] : vector<1x16x256xf32> to vector<1xf32>
      %116 = vector.shape_cast %115 : vector<1xf32> to vector<1x1x1xf32>
      %117 = vector.extract %116[0, 0, 0] : f32 from vector<1x1x1xf32>
      %118 = vector.broadcast %117 : f32 to vector<1x1xf32>
      %cst_62 = arith.constant 1.000000e+04 : f32
      %119 = vector.broadcast %cst_62 : f32 to vector<1x1xf32>
      %120 = arith.subf %119, %118 : vector<1x1xf32>
      %121 = arith.subf %106, %112 : vector<1x1xf32>
      %cst_63 = arith.constant 0.000000e+00 : f32
      %122 = vector.broadcast %cst_63 : f32 to vector<1x1xf32>
      %123 = arith.cmpf ogt, %118, %122 : vector<1x1xf32>
      %cst_64 = arith.constant 1.000000e+00 : f32
      %124 = vector.broadcast %cst_64 : f32 to vector<1x1xf32>
      %125 = arith.maximumf %118, %124 : vector<1x1xf32>
      %126 = arith.divf %112, %125 : vector<1x1xf32>
      %cst_65 = arith.constant 0.000000e+00 : f32
      %127 = vector.broadcast %cst_65 : f32 to vector<1x1xf32>
      %128 = arith.select %123, %126, %127 : vector<1x1xi1>, vector<1x1xf32>
      %cst_66 = arith.constant 0.000000e+00 : f32
      %129 = vector.broadcast %cst_66 : f32 to vector<1x1xf32>
      %130 = arith.cmpf ogt, %120, %129 : vector<1x1xf32>
      %cst_67 = arith.constant 1.000000e+00 : f32
      %131 = vector.broadcast %cst_67 : f32 to vector<1x1xf32>
      %132 = arith.maximumf %120, %131 : vector<1x1xf32>
      %133 = arith.divf %121, %132 : vector<1x1xf32>
      %cst_68 = arith.constant 0.000000e+00 : f32
      %134 = vector.broadcast %cst_68 : f32 to vector<1x1xf32>
      %135 = arith.select %130, %133, %134 : vector<1x1xi1>, vector<1x1xf32>
      %136 = arith.addf %128, %135 : vector<1x1xf32>
      %cst_69 = arith.constant 0.000000e+00 : f32
      %137 = vector.broadcast %cst_69 : f32 to vector<1x1xf32>
      %138 = arith.subf %137, %136 : vector<1x1xf32>
      %cst_70 = arith.constant 1.000000e+00 : f32
      %139 = vector.broadcast %cst_70 : f32 to vector<1x1xf32>
      %140 = arith.mulf %138, %139 : vector<1x1xf32>
      %141 = vector.shape_cast %140 : vector<1x1xf32> to vector<1x1xf32>
      %142 = vector.broadcast %141 : vector<1x1xf32> to vector<8x128xf32>
      %c0_71 = arith.constant 0 : index
      %c0_72 = arith.constant 0 : index
      %c0_73 = arith.constant 0 : index
      %143 = vector.load %arg4[%c0_71, %c0_72, %c0_73] : memref<1x8x128xf32, #tpu.memory_space<vmem>>, vector<1x8x128xf32>
      %144 = vector.shape_cast %143 : vector<1x8x128xf32> to vector<8x128xf32>
      %145 = vector.shape_cast %142 : vector<8x128xf32> to vector<1x8x128xf32>
      tpu.vector_store %arg4[%c0_71, %c0_72, %c0_73], %145 {strides = array<i32>} : memref<1x8x128xf32, #tpu.memory_space<vmem>>, vector<1x8x128xf32>,
    } else {
    }
    return
  }
  func.func @transform_0(%arg0: i32, %arg1: i32) -> (i32, i32, i32) {
    %c0_i32 = arith.constant 0 : i32
    %c0_i32_0 = arith.constant 0 : i32
    return %arg0, %c0_i32, %arg1 : i32, i32, i32
  }
  func.func @transform_1(%arg0: i32, %arg1: i32) -> (i32, i32, i32) {
    %c0_i32 = arith.constant 0 : i32
    %c0_i32_0 = arith.constant 0 : i32
    return %arg0, %c0_i32, %arg1 : i32, i32, i32
  }
  func.func @transform_2(%arg0: i32, %arg1: i32) -> (i32, i32, i32) {
    %c0_i32 = arith.constant 0 : i32
    %c0_i32_0 = arith.constant 0 : i32
    %c0_i32_1 = arith.constant 0 : i32
    return %arg0, %c0_i32, %c0_i32_0 : i32, i32, i32
  }
}

</mosaic_0001>

<bundles_post_ra>
// kernel: tpu_custom_call.1
= control target key start
LH: loop header
LB: loop body
LE: loop exit
PB: predicated region body
PF: predicated region fallthrough
CT: control target
= control target key end

     0   :  { %7 = vsyncpa [#allocation6], 0  ;;  %s1180_s0 = inlined_call_operand.hbm [shape: f32[2,16,625], index: 0, kind: input, shape index: {}]   ;;  %s1181_s1 = inlined_call_operand.hbm [shape: bf16[2,16,625], index: 1, kind: input, shape index: {}]   ;;  %s1182_s2 = inlined_call_operand.hbm [shape: f32[2,8,128], index: 2, kind: output, shape index: {}]  }
   0x1   :  { %9 = vsyncpa [#allocation6 + $0x1], 0 }
   0x2   :  { %10 = vsyncpa [#allocation9], 0 }
   0x3   :  { %12 = vsyncpa [#allocation9 + $0x1], 0 }
   0x4   :  { %13 = vsyncpa [#allocation7], 0 }
   0x5   :  { %15 = vsyncpa [#allocation7 + $0x1], 0  ;;  %s940_s9 = smov 0   ;;  %s942_s10 = smov 0  }
   0x6   :  { %s944_s11 = smov 0   ;;  %s946_s12 = smov 0  }
   0x7   :  { %s948_s13 = smov 0   ;;  %s950_s14 = smov 0  }
   0x8 LB: > { %s675_s15 = sadd.s32 4294967295, %s914_s14   ;;  %s676_s16 = sadd.s32 4294967294, %s914_s14   ;;  %s914_s14 = sphi %s950_s14, %s21_s14   ;;  %s910_s13 = sphi %s948_s13, %s1213_s13   ;;  %s906_s12 = sphi %s946_s12, %s1212_s12   ;;  %s902_s11 = sphi %s944_s11, %s1211_s11   ;;  %s898_s10 = sphi %s942_s10, %s1210_s10   ;;  %s894_s9 = sphi %s940_s9, %s1209_s9  }
   0x9   : > { %s33_s17 = sadd.s32 1, %s910_s13  ;;  %s42_s18 = sadd.s32 1, %s902_s11 }
   0xa   : > { %p35_p0 = scmp.ge.s32.totalorder %s33_s17, 2  ;;  %p49_p1 = scmp.ne.s32.totalorder %s902_s11, %s898_s10 }
   0xb   : > { %p50_p2 = scmp.eq.s32.totalorder %s914_s14, 0  ;;  %p55_p3 = scmp.ne.s32.totalorder %s898_s10, %s894_s9 }
   0xc   : > { %s1215_s17 = smov (%p35_p0, %s33_s17), 0  ;;  %p56_p5 = scmp.eq.s32.totalorder %s675_s15, 0 }
   0xd   : > { %p981_p4 = por %p50_p2, %p49_p1  ;;  %s37_s20 = ssub.s32 %s910_s13, %s1215_s17 }
   0xe   : > { %p107_p6 = scmp.eq.s32.totalorder %s675_s15, 1  ;;  %p40_p7 = scmp.eq.s32.totalorder %s37_s20, 0 }
   0xf   : > { %p987_p8 = por %p56_p5, %p55_p3  ;;  %p113_p10 = scmp.eq.s32.totalorder %s676_s16, 1 }
  0x10   : > { %p991_p9 = por %p107_p6, %p49_p1  ;;  %p1183_p12 = scmp.ge.s32.totalorder %s914_s14, 2 }
  0x11   : > { %s996_s23 = scalar_select %p40_p7, %s902_s11, %s42_s18  }
  0x12   : > { %p998_p11 = por %p113_p10, %p55_p3  ;;  %129 = sbr.rel (%p1183_p12) target bundleno = 63 (0x3f), region = 16 }
  0x17   : > { %132 = sbr.rel (!%p981_p4) target bundleno = 43 (0x2b), region = 20  ;;  %s133_s25 = sand.u32 (%p981_p4), 1, %s902_s11  }
  0x18   : > { %s687_s26 = smul.u32 (%p981_p4), 96, %s133_s25  ;;  %s134_s27 = scalar_lea.sflag (%p981_p4), [#allocation6], %s133_s25 }
  0x1a   : > { %s137_s28 = scalar_lea.vmem (%p981_p4), [#allocation5], %s687_s26 }
  0x1c   : > { %143 = vsyncadd %s134_s27, 256  ;;  %s688_s29 = smul.u32 1280, %s910_s13  ;;  %s151_s30 = sshll.u32 %s137_s28, 4  ;;  %s152_s30 = int_to_ptr.vmem [resolvable:$true] %s151_s30 }
  0x1d   : > { %s796_s6 = scalar_lea.vmem %s152_s30, 1280  ;;  %s916_s7 = smov [#allocation5]  }
  0x1e   : > { %s148_s5 = scalar_lea.hbm %s1180_s0, %s688_s29  ;;  %p797_p13 = scmp.ne.s32.totalorder %s152_s30, %s796_s6 }
  0x1f   : > { %s798_s8 = sshll.u32 %s916_s7, 4  ;;  %s799_s8 = int_to_ptr.vmem [resolvable:$false] %s798_s8 }
  0x20   : > { %s800_s15 = scalar_lea.vmem %s799_s8, 3072  ;;  %p801_p0 = scmp.lt.s32.totalorder %s152_s30, %s799_s8 }
  0x21   : > { %p802_p1 = scmp.lt.s32.totalorder %s800_s15, %s796_s6 }
  0x23   : > { %p803_p2 = por %p802_p1, %p801_p0 }
  0x25   : > { %p804_p3 = pnand %p803_p2, %p797_p13 }
  0x27   : > { %807 = shalt.err (!%p804_p3)
}
  0x28   : > { %s917_s16 = smov 640   ;;  %s918_s18 = smov 768  }
  0x29   : > { %s919_s20 = smov 40  }
  0x2a   : > { %157 = dma.hbm_to_vmem [thread:$0]  %s148_s5, 1280, %s152_s30, %s134_s27, %s917_s16, %s918_s18, %s919_s20  }
  0x2b PF: > { %160 = sbr.rel (!%p981_p4) target bundleno = 63 (0x3f), region = 24  ;;  %s161_s25 = sand.u32 (%p981_p4), 1, %s902_s11  }
  0x2c   : > { %s689_s26 = smul.u32 (%p981_p4), 48, %s161_s25  ;;  %s162_s28 = scalar_lea.sflag (%p981_p4), [#allocation9], %s161_s25 }
  0x2e   : > { %s165_s29 = scalar_lea.vmem (%p981_p4), [#allocation8], %s689_s26 }
  0x30   : > { %171 = vsyncadd %s162_s28, 128  ;;  %s690_s3 = smul.u32 640, %s910_s13  ;;  %s179_s4 = sshll.u32 %s165_s29, 4  ;;  %s180_s4 = int_to_ptr.vmem [resolvable:$true] %s179_s4 }
  0x31   : > { %s818_s15 = scalar_lea.vmem %s180_s4, 640  ;;  %s920_s27 = smov [#allocation8]  }
  0x32   : > { %s176_s8 = scalar_lea.hbm %s1181_s1, %s690_s3  ;;  %p819_p5 = scmp.ne.s32.totalorder %s180_s4, %s818_s15 }
  0x33   : > { %s820_s30 = sshll.u32 %s920_s27, 4  ;;  %s821_s30 = int_to_ptr.vmem [resolvable:$false] %s820_s30 }
  0x34   : > { %s822_s19 = scalar_lea.vmem %s821_s30, 1536  ;;  %p823_p4 = scmp.lt.s32.totalorder %s180_s4, %s821_s30 }
  0x35   : > { %p824_p6 = scmp.lt.s32.totalorder %s822_s19, %s818_s15 }
  0x37   : > { %p825_p7 = por %p824_p6, %p823_p4 }
  0x39   : > { %p826_p10 = pnand %p825_p7, %p819_p5 }
  0x3b   : > { %829 = shalt.err (!%p826_p10)
}
  0x3c   : > { %s921_s5 = smov 320   ;;  %s922_s16 = smov 384  }
  0x3d   : > { %s923_s18 = smov 20  }
  0x3e   : > { %185 = dma.hbm_to_vmem [thread:$0]  %s176_s8, 640, %s180_s4, %s162_s28, %s921_s5, %s922_s16, %s923_s18  }
  0x3f PF: > { %p681_p13 = scmp.ge.s32.totalorder %s914_s14, 1  ;;  %p187_p0 = scmp.lt.s32.totalorder %s914_s14, 3 }
  0x41   : > { %p188_p1 = pnand %p681_p13, %p187_p0 }
  0x42   : > { %s1022_s20 = sand.u32 (!%p188_p1), 1, %s898_s10  }
  0x43   : > { %191 = sbr.rel (%p188_p1) target bundleno = 370 (0x172), region = 28  ;;  %s194_s26 = scalar_lea.sflag (!%p188_p1), [#allocation6], %s1022_s20 }
  0x44   : > { %s691_s25 = smul.u32 (!%p188_p1), 96, %s1022_s20 }
  0x46   : > { %s1026_s29 = scalar_lea.vmem (!%p188_p1), [#allocation5], %s691_s25 }
  0x48   : > { %881 = dma.done.wait (%p987_p8), %s194_s26, 1536  }
  0x49   : > { %883 = vsyncadd (%p987_p8), %s194_s26, 4294965760  ;;  %s692_s28 = smul.u32 48, %s1022_s20  ;;  %s203_s3 = scalar_lea.sflag [#allocation9], %s1022_s20 }
  0x4b   : > { %s206_s4 = scalar_lea.vmem [#allocation8], %s692_s28 }
  0x4c   : > { %885 = dma.done.wait (%p987_p8), %s203_s3, 768  }
  0x4d   : > { %887 = vsyncadd (%p987_p8), %s203_s3, 4294966528  ;;  %v254_v0 = vlaneseq  ;;  %v274_v3 = vld [vmem:[%s206_s4] sm:$0xff]  ;;  %v275_v4 = vld [vmem:[%s206_s4 + $0x18] sm:$0xff]  ;;  %s682_s8 = sshll.u32 %s1022_s20, 3  ;;  %s684_s15 = sshll.u32 %s906_s12, 7 }
  0x4e   : > { %v337_v5 = vld [vmem:[%s1026_s29 + $0x10] sm:$0xff]  ;;  %v277_v6 = vunpack.c.h.bf16 %v274_v3  ;;  %v278_v7 = vunpack.c.l.bf16 %v275_v4  ;;  %v279_v8 = vunpack.c.h.bf16 %v275_v4  ;;  %v338_v9 = vld [vmem:[%s1026_s29 + $0x18] sm:$0xff]  ;;  %v339_v10 = vld [vmem:[%s1026_s29 + $0x40] sm:$0xff]  ;;  %v276_v12 = vunpack.c.l.bf16 %v274_v3  ;;  %s231_s27 = scalar_lea.vmem [#allocation10], %s682_s8  ;;  %s566_s16 = scalar_lea.hbm %s1182_s2, %s684_s15 }
  0x4f   : > { %v255_v1 = vand.u32 127, %v254_v0  ;;  %v340_v11 = vld [vmem:[%s1026_s29 + $0x48] sm:$0xff]  ;;  %v342_v14 = vld [vmem:[%s206_s4 + $0x20] sm:$0xff]  ;;  %v357_v15 = vsub.f32 1.0, %v337_v5  ;;  %v358_v16 = vsub.f32 1.0, %v338_v9  ;;  %v359_v17 = vsub.f32 1.0, %v339_v10 }
  0x50   : > { %v341_v13 = vld [vmem:[%s206_s4 + $0x8] sm:$0xff]  ;;  %vm1045_vm1 = vcmp.eq.f32.partialorder %v277_v6, 1.0  ;;  %vm1049_vm2 = vcmp.eq.f32.partialorder %v278_v7, 1.0  ;;  %v360_v21 = vsub.f32 1.0, %v340_v11  ;;  %vm1053_vm3 = vcmp.eq.f32.partialorder %v279_v8, 1.0  ;;  %v270_v34 = vld [vmem:[%s1026_s29] sm:$0xff] }
  0x51   : > { %v1038_v2 = vadd.s32 512, %v255_v1  ;;  %v343_v20 = vunpack.c.l.bf16 %v341_v13  ;;  %v409_v22 = vld [vmem:[%s206_s4 + $0x10] ss:$24 sps:$4 sm:$0xff]   ;;  %v344_v24 = vunpack.c.h.bf16 %v341_v13  ;;  %v345_v25 = vunpack.c.l.bf16 %v342_v14  ;;  %s568_s30 = sshll.u32 %s231_s27, 4  ;;  %s555_s18 = scalar_lea.sflag [#allocation7], %s1022_s20  ;;  %s569_s30 = int_to_ptr.vmem [resolvable:$true] %s568_s30 }
  0x52   : > { %v346_v26 = vunpack.c.h.bf16 %v342_v14  ;;  %v411_v29 = vunpack.c.l.bf16 %v409_v22  ;;  %v413_v30 = vunpack.c.h.bf16 %v409_v22  ;;  %v271_v35 = vld [vmem:[%s1026_s29 + $0x8] sm:$0xff]  ;;  %vm1075_vm8 = vcmp.eq.f32.partialorder %v276_v12, 1.0  ;;  %v272_v41 = vld [vmem:[%s1026_s29 + $0x30] sm:$0xff]  ;;  %v273_v42 = vld [vmem:[%s1026_s29 + $0x38] sm:$0xff]  ;;  %s830_s25 = scalar_lea.vmem %s569_s30, 128  ;;  %s924_s26 = smov [#allocation10]  }
  0x53   : > { %vm419_vm0 = vcmp.lt.s32.totalorder %v1038_v2, 625  ;;  %vm1057_vm4 = vcmp.eq.f32.partialorder %v343_v20, 1.0  ;;  %v401_v28 = vadd.f32 %v343_v20, %v276_v12  ;;  %vm1061_vm5 = vcmp.eq.f32.partialorder %v344_v24, 1.0  ;;  %v405_v62 = vld [vmem:[%s1026_s29 + $0x20] sm:$0xff]  ;;  %v407_v63 = vld [vmem:[%s1026_s29 + $0x50] sm:$0xff]  ;;  %p831_p8 = scmp.ne.s32.totalorder %s569_s30, %s830_s25  ;;  %s834_s29 = sshll.u32 %s924_s26, 4  ;;  %s835_s29 = int_to_ptr.vmem [resolvable:$false] %s834_s29 }
  0x54   : > { %vm1065_vm6 = vcmp.eq.f32.partialorder %v345_v25, 1.0  ;;  %vm1069_vm7 = vcmp.eq.f32.partialorder %v346_v26, 1.0  ;;  %v361_v37 = vsel %vm1057_vm4, %v337_v5, %v357_v15  ;;  %v362_v38 = vsel %vm1061_vm5, %v338_v9, %v358_v16  ;;  %s836_s12 = scalar_lea.vmem %s835_s29, 256  ;;  %p837_p5 = scmp.lt.s32.totalorder %s569_s30, %s835_s29 }
  0x55   : > { %v363_v39 = vsel %vm1065_vm6, %v339_v10, %v359_v17  ;;  %v402_v40 = vadd.f32 %v344_v24, %v277_v6  ;;  %v364_v43 = vsel %vm1069_vm7, %v340_v11, %v360_v21  ;;  %v403_v45 = vadd.f32 %v345_v25, %v278_v7  ;;  %p832_p2 = pnand %p831_p8, %p991_p9  ;;  %p838_p4 = scmp.lt.s32.totalorder %s836_s12, %s830_s25 }
  0x56   : > { %v367_v44 = vmax.f32 %v363_v39, 0.0  ;;  %v465_v46 = vsel %vm419_vm0, %v411_v29, 0.0  ;;  %v467_v47 = vsel %vm419_vm0, %v413_v30, 0.0  ;;  %v289_v49 = vsub.f32 1.0, %v270_v34 }
  0x57   : > { %v469_v48 = vadd.f32 %v465_v46, %v401_v28  ;;  %v290_v50 = vsub.f32 1.0, %v271_v35  ;;  %v404_v51 = vadd.f32 %v346_v26, %v279_v8  ;;  %v471_v52 = vadd.f32 %v467_v47, %v403_v45  ;;  %p833_p3 = pneg %p832_p2  ;;  %p839_p6 = por %p838_p4, %p837_p5 }
  0x58   : > { %v291_v53 = vsub.f32 1.0, %v272_v41  ;;  %v292_v54 = vsub.f32 1.0, %v273_v42  ;;  %762 = vlog2.f32 %v367_v44  ;;  %v293_v56 = vsel %vm1075_vm8, %v270_v34, %v289_v49 }
  0x59   : > { %v526_v55 = vadd.f32 %v469_v48, %v402_v40  ;;  %v294_v57 = vsel %vm1045_vm1, %v271_v35, %v290_v50  ;;  %v297_v60 = vmax.f32 %v293_v56, 0.0  ;;  %v365_v4 = vmax.f32 %v361_v37, 0.0  ;;  %p840_p7 = pnand %p839_p6, %p833_p3 }
  0x5a   : > { %v295_v58 = vsel %vm1049_vm2, %v272_v41, %v291_v53  ;;  %v296_v59 = vsel %vm1053_vm3, %v273_v42, %v292_v54  ;;  %v298_v61 = vmax.f32 %v294_v57, 0.0  ;;  %v366_v5 = vmax.f32 %v362_v38, 0.0 }
  0x5b   : > { %v527_v0 = vadd.f32 %v526_v55, %v471_v52  ;;  %v299_v1 = vmax.f32 %v295_v58, 0.0  ;;  %v300_v3 = vmax.f32 %v296_v59, 0.0  ;;  %764 = vlog2.f32 %v297_v60 }
  0x5c   : > { %vm1103_vm9 = vcmp.eq.f32.partialorder %v411_v29, 1.0  ;;  %vm1107_vm10 = vcmp.eq.f32.partialorder %v413_v30, 1.0  ;;  %v425_v9 = vsub.f32 1.0, %v405_v62  ;;  %v427_v10 = vsub.f32 1.0, %v407_v63 }
  0x5d   : > { %v528_v8 = vadd.f32 %v527_v0, %v404_v51  ;;  %766 = vlog2.f32 %v299_v1  ;;  %v368_v11 = vmax.f32 %v364_v43, 0.0 }
  0x5e   : > { %768 = vlog2.f32 %v298_v61  ;;  %v429_v12 = vsel %vm1103_vm9, %v405_v62, %v425_v9  ;;  %v431_v13 = vsel %vm1107_vm10, %v407_v63, %v427_v10 }
  0x5f   : > { %529 = vadd.xlane.f32.xlu1 %v528_v8  ;;  %770 = vlog2.f32 %v300_v3  ;;  %v433_v14 = vmax.f32 %v429_v12, 0.0  ;;  %v435_v15 = vmax.f32 %v431_v13, 0.0 }
  0x60   : > { %772 = vlog2.f32 %v365_v4 }
  0x61   : > { %774 = vlog2.f32 %v366_v5 }
  0x62   : > { %776 = vlog2.f32 %v368_v11 }
  0x63   : > { %778 = vlog2.f32 %v433_v14 }
  0x64   : > { %780 = vlog2.f32 %v435_v15 }
  0x65   : > { %v763_v16 = vpop.eup %762 }
  0x66   : > { %v374_v20 = vmul.f32 0.6931472, %v763_v16 }
  0x68   : > { %v765_v17 = vpop.eup %764  ;;  %v379_v34 = vmax.f32 %v374_v20, -100.0 }
  0x69   : > { %v302_v22 = vmul.f32 0.6931472, %v765_v17 }
  0x6a   : > { %v767_v21 = vpop.eup %766  ;;  %v391_v42 = vsel %vm1065_vm6, %v379_v34, 0.0 }
  0x6b   : > { %v769_v24 = vpop.eup %768  ;;  %v306_v25 = vmul.f32 0.6931472, %v767_v21  ;;  %v309_v37 = vmax.f32 %v302_v22, -100.0 }
  0x6c   : > { %v771_v26 = vpop.eup %770  ;;  %v304_v28 = vmul.f32 0.6931472, %v769_v24 }
  0x6d   : > { %v773_v29 = vpop.eup %772  ;;  %v308_v30 = vmul.f32 0.6931472, %v771_v26  ;;  %v311_v40 = vmax.f32 %v306_v25, -100.0  ;;  %v321_v47 = vsel %vm1075_vm8, %v309_v37, 0.0 }
  0x6e   : > { %v775_v35 = vpop.eup %774  ;;  %v370_v38 = vmul.f32 0.6931472, %v773_v29  ;;  %v310_v44 = vmax.f32 %v304_v28, -100.0 }
  0x6f   : > { %v777_v39 = vpop.eup %776  ;;  %v372_v41 = vmul.f32 0.6931472, %v775_v35  ;;  %v312_v49 = vmax.f32 %v308_v30, -100.0  ;;  %v323_v52 = vsel %vm1049_vm2, %v311_v40, 0.0  ;;  %v387_v56 = vadd.f32 %v379_v34, %v311_v40 }
  0x70   : > { %v779_v43 = vpop.eup %778  ;;  %v376_v45 = vmul.f32 0.6931472, %v777_v39  ;;  %v377_v46 = vmax.f32 %v370_v38, -100.0  ;;  %v322_v32 = vsel %vm1045_vm1, %v310_v44, 0.0  ;;  %v395_v62 = vadd.f32 %v391_v42, %v323_v52 }
  0x71   : > { %v781_v48 = vpop.eup %780  ;;  %v378_v50 = vmax.f32 %v372_v41, -100.0  ;;  %v438_v51 = vmul.f32 0.6931472, %v779_v43  ;;  %v324_v31 = vsel %vm1053_vm3, %v312_v49, 0.0 }
  0x72   : > { %v385_v53 = vadd.f32 %v377_v46, %v309_v37  ;;  %v442_v54 = vmul.f32 0.6931472, %v781_v48  ;;  %v389_v55 = vsel %vm1057_vm4, %v377_v46, 0.0  ;;  %v380_v59 = vmax.f32 %v376_v45, -100.0 }
  0x73   : > { %v445_v57 = vmax.f32 %v438_v51, -100.0  ;;  %v390_v36 = vsel %vm1061_vm5, %v378_v50, 0.0  ;;  %v393_v58 = vadd.f32 %v389_v55, %v321_v47  ;;  %v386_v60 = vadd.f32 %v378_v50, %v310_v44 }
  0x74   : > { %v447_v61 = vmax.f32 %v442_v54, -100.0  ;;  %v394_v63 = vadd.f32 %v390_v36, %v322_v32  ;;  %v392_v4 = vsel %vm1069_vm7, %v380_v59, 0.0  ;;  %v388_v8 = vadd.f32 %v380_v59, %v312_v49 }
  0x75   : > { %v449_v19 = vsel %vm419_vm0, %v445_v57, 0.0  ;;  %v396_v12 = vadd.f32 %v392_v4, %v324_v31 }
  0x76   : > { %v451_v18 = vsel %vm419_vm0, %v447_v61, 0.0  ;;  %v453_v0 = vadd.f32 %v449_v19, %v385_v53  ;;  %v457_v27 = vsel %vm1103_vm9, %v449_v19, 0.0 }
  0x77   : > { %v455_v1 = vadd.f32 %v451_v18, %v387_v56  ;;  %v459_v3 = vsel %vm1107_vm10, %v451_v18, 0.0  ;;  %v461_v5 = vadd.f32 %v457_v27, %v393_v58 }
  0x78   : > { %v492_v9 = vadd.f32 %v453_v0, %v386_v60  ;;  %v463_v10 = vadd.f32 %v459_v3, %v395_v62 }
  0x79   : > { %v509_v2 = vadd.f32 %v461_v5, %v394_v63 }
  0x7a   : > { %v493_v11 = vadd.f32 %v492_v9, %v455_v1 }
  0x7b   : > { %v510_v13 = vadd.f32 %v509_v2, %v463_v10 }
  0x7c   : > { %v494_v6 = vadd.f32 %v493_v11, %v388_v8 }
  0x7d   : > { %v511_v14 = vadd.f32 %v510_v13, %v396_v12 }
  0x7e   : > { %495 = vadd.xlane.f32.xlu0 %v494_v6 }
  0x82   : > { %512 = vadd.xlane.f32.xlu0 %v511_v14 }
  0xe8   : > { %v530_v23 = vpop.xlane.xlu1 %529 }
  0xe9   : > { %v531_v15 = vrot.slane %v530_v23, 4 }
  0xeb   : > { %v532_v16 = vadd.f32 %v531_v15, %v530_v23 }
  0xed   : > { %v533_v33 = vrot.slane %v532_v16, 2 }
  0xef   : > { %v534_v28 = vadd.f32 %v533_v33, %v532_v16 }
  0xf1   : > { %v535_v37 = vrot.slane %v534_v28, 1 }
  0xf3   : > { %v536_v40 = vadd.f32 %v535_v37, %v534_v28 }
 0x107   : > { %v496_v7 = vpop.xlane.xlu0 %495 }
 0x108   : > { %v497_v17 = vrot.slane %v496_v7, 4 }
 0x10a   : > { %v498_v20 = vadd.f32 %v497_v17, %v496_v7 }
 0x10b   : > { %v513_v21 = vpop.xlane.xlu0 %512 }
 0x10c   : > { %v499_v22 = vrot.slane %v498_v20, 2  ;;  %v514_v24 = vrot.slane %v513_v21, 4 }
 0x10e   : > { %v515_v25 = vadd.f32 %v514_v24, %v513_v21  ;;  %v500_v26 = vadd.f32 %v499_v22, %v498_v20 }
 0x110   : > { %v516_v29 = vrot.slane %v515_v25, 2  ;;  %v501_v30 = vrot.slane %v500_v26, 1 }
 0x112   : > { %v517_v34 = vadd.f32 %v516_v29, %v515_v25  ;;  %v502_v35 = vadd.f32 %v501_v30, %v500_v26 }
 0x114   : > { %693 = vpush %v502_v35  ;;  %v518_v38 = vrot.slane %v517_v34, 1 }
 0x116   : > { %v519_v39 = vadd.f32 %v518_v38, %v517_v34 }
 0x118   : > { %695 = vpush %v519_v39 }
 0x119   : > { %697 = vpush %v536_v40 }
 0x145   : > { %s694_s21 = spop %693 }
 0x146   : > { %v504_v47 = vstv %s694_s21 }
 0x149   : > { %s696_s6 = spop %695 }
 0x14a   : > { %s698_s7 = spop %697  ;;  %v521_v45 = vstv %s696_s6 }
 0x14b   : > { %v538_v41 = vstv %s698_s7  ;;  %v540_v48 = vsub.f32 %v504_v47, %v521_v45 }
 0x14c   : > { %v539_v42 = vsub.f32 10000.0, %v538_v41  ;;  %v542_v43 = vmax.f32 %v538_v41, 1.0  ;;  %vm541_vm11 = vcmp.gt.f32.partialorder %v538_v41, 0.0 }
 0x14e   : > { %782 = vrcp.f32 %v542_v43  ;;  %v547_v44 = vmax.f32 %v539_v42, 1.0  ;;  %vm546_vm12 = vcmp.gt.f32.partialorder %v539_v42, 0.0 }
 0x150   : > { %784 = vrcp.f32 %v547_v44 }
 0x15b   : > { %v783_v46 = vpop.eup %782 }
 0x15c   : > { %v544_v49 = vmul.f32 %v783_v46, %v521_v45 }
 0x15d   : > { %v785_v50 = vpop.eup %784 }
 0x15e   : > { %v549_v51 = vmul.f32 %v785_v50, %v540_v48  ;;  %v545_v52 = vsel %vm541_vm11, %v544_v49, 0.0 }
 0x160   : > { %v550_v53 = vsel %vm546_vm12, %v549_v51, 0.0 }
 0x161   : > { %v551_v54 = vadd.f32 %v550_v53, %v545_v52 }
 0x163   : > { %v552_v32 = vsub.f32 0.0, %v551_v54 }
 0x165   : > { %553 = vst [vmem:[%s231_s27] sm:$0xff] %v552_v32 }
 0x166   : > { %843 = shalt.err (!%p840_p7)
}
 0x167   : > { %s844_s28 = scalar_lea.hbm %s566_s16, 128  ;;  %s848_s4 = scalar_lea.hbm %s1182_s2, 256 }
 0x168   : > { %p845_p10 = scmp.ne.s32.totalorder %s566_s16, %s844_s28  ;;  %p849_p1 = scmp.lt.s32.totalorder %s566_s16, %s1182_s2 }
 0x169   : > { %p850_p8 = scmp.lt.s32.totalorder %s848_s4, %s844_s28 }
 0x16a   : > { %p846_p13 = pnand %p845_p10, %p991_p9 }
 0x16b   : > { %p851_p2 = por %p850_p8, %p849_p1 }
 0x16c   : > { %p847_p0 = pneg %p846_p13 }
 0x16e   : > { %p852_p12 = pnand %p851_p2, %p847_p0 }
 0x170   : > { %855 = shalt.err (!%p852_p12)
}
 0x171   : > { %701 = dma.vmem_to_hbm [thread:$0]  (%p991_p9), %s569_s30, 128, %s566_s16, %s555_s18  }
 0x172 PF: > { %s580_s7 = sand.u32 1, %s894_s9   ;;  %p1208_p3 = scmp.ge.s32.totalorder %s914_s14, 2 }
 0x173   : > { %s581_s8 = scalar_lea.sflag [#allocation7], %s580_s7 }
 0x174   : > { %p704_p5 = pnand %p1208_p3, %p998_p11 }
 0x176   : > { %p705_p4 = pneg %p704_p5 }
 0x178   : > { %889 = dma.done.wait (%p705_p4), %s581_s8, 128  }
 0x179   : > { %891 = vsyncadd (%p705_p4), %s581_s8, 4294967168  ;;  %s21_s14 = sadd.s32 1, %s914_s14   ;;  %s1209_s9 = smov %s898_s10 }
 0x17a   : > { %p18_p6 = scmp.ge.s32.totalorder %s21_s14, 4   ;;  %s1210_s10 = smov %s902_s11 }
 0x17b   : > { %s1211_s11 = smov %s996_s23  ;;  %s1212_s12 = smov %s910_s13 }
 0x17c   : > { %s1213_s13 = smov %s1215_s17  ;;  %20 = sbr.rel (!%p18_p6) target bundleno = 8 (0x8), region = 94 }
 0x181   :  { %586 = vsyncpa [#allocation6], 1 }
 0x182   :  { %588 = vsyncpa [#allocation6 + $0x1], 1 }
 0x183   :  { %589 = vsyncpa [#allocation9], 1 }
 0x184   :  { %591 = vsyncpa [#allocation9 + $0x1], 1 }
 0x185   :  { %592 = vsyncpa [#allocation7], 1 }
 0x186   :  { %594 = vsyncpa [#allocation7 + $0x1], 1 }

</bundles_post_ra>
